<compile_context>
chip_gen: v6e
topology: v6e:2x2x1
jax: 0.10.0
libtpu: 0.0.40
codegen_flags: <defaults>
</compile_context>

<pallas_src>
import functools
import math

import jax
import jax.numpy as jnp
from jax.experimental import pallas as pl
from jax.experimental.pallas import tpu as pltpu

_LANE = 128
_SUB = 8
_MIB = 1024 * 1024


def _round_up(x: int, m: int) -> int:
    return ((x + m - 1) // m) * m


def _round_down(x: int, m: int) -> int:
    return max(m, (x // m) * m)


def _single_k_kernel(x_ref, w_ref, b_ref, o_ref, *, compute_dtype):
    # x_ref: (tm, D_in), w_ref: (D_in, tn), b_ref: (1, tn), o_ref: (tm, tn)
    x = x_ref[...]
    w = w_ref[...]
    if compute_dtype is not None and x.dtype != compute_dtype:
        x = x.astype(compute_dtype)
        w = w.astype(compute_dtype)
    acc = jnp.dot(x, w, preferred_element_type=jnp.float32)
    o_ref[...] = (acc + b_ref[...].astype(jnp.float32)).astype(o_ref.dtype)


def _multi_k_kernel(x_ref, w_ref, b_ref, o_ref, acc_ref, *, compute_dtype, num_k):
    # Grid = (m, j, n, k); contraction axis k innermost ("arbitrary").
    # program_id only at kernel top level (interpret-mode / lowering safe).
    k = pl.program_id(3)
    x = x_ref[...]
    w = w_ref[...]
    if compute_dtype is not None and x.dtype != compute_dtype:
        x = x.astype(compute_dtype)
        w = w.astype(compute_dtype)
    p = jnp.dot(x, w, preferred_element_type=jnp.float32)

    is_first = k == 0
    is_last = k == num_k - 1  # num_k is a static Python int (>= 2 here)

    @pl.when(is_first)
    def _():
        acc_ref[...] = p

    @pl.when((k > 0) & jnp.logical_not(is_last))
    def _():
        acc_ref[...] = acc_ref[...] + p

    # Fused final step: no extra accumulator store + reload before the output.
    @pl.when(is_last)
    def _():
        o_ref[...] = (acc_ref[...] + p + b_ref[...].astype(jnp.float32)).astype(
            o_ref.dtype
        )


def parallel_linear(
    state,
    weights,
    biases,
    *,
    tm=None,
    tn=None,
    tk=None,
    compute_dtype=jnp.bfloat16,
    out_dtype=None,
    max_single_k=2048,
):
    """out[n] = state[n] @ weights[n] + biases[n].

    state:   (N, B, S, D_in)
    weights: (N, D_in, D_out)
    biases:  (N, D_out)
    returns  (N, B, S, D_out)

    compute_dtype (default bf16) is applied *inside* the kernel (VPU cast) so
    the wrapper never materializes a casted copy in HBM; accumulation is f32.
    Pass compute_dtype=None for a full-f32 MXU path.
    """
    N, B, S, D_in = state.shape
    D_out = weights.shape[-1]
    assert weights.shape == (N, D_in, D_out)
    assert biases.shape == (N, D_out)

    out_dtype = jnp.dtype(out_dtype or state.dtype)
    compute_dtype = None if compute_dtype is None else jnp.dtype(compute_dtype)

    M = B * S
    x = state.reshape(N, M, D_in)  # metadata-only reshape
    in_bytes = jnp.dtype(x.dtype).itemsize
    out_bytes = out_dtype.itemsize

    # --- VMEM budget from the actual chip (conservative fallback off-TPU).
    try:
        vmem_cap = int(pltpu.get_tpu_info().vmem_capacity_bytes)
    except Exception:
        vmem_cap = 64 * _MIB
    if vmem_cap <= 0:
        vmem_cap = 64 * _MIB
    budget = int(0.70 * vmem_cap)

    # --- K tile: prefer a single K pass (no scratch, no K grid axis).
    if tk is None:
        tk = D_in if D_in <= max_single_k else 2048
    if tk >= D_in:
        tk = D_in
    else:
        tk = _round_down(min(tk, D_in), _LANE)
    multi_k = tk < D_in
    din_pad = _round_up(D_in, tk) if multi_k else D_in
    num_k = din_pad // tk

    # --- M / D_out tiles: large for arithmetic intensity, shrunk to budget.
    tm = 1024 if tm is None else tm
    tn = 1024 if tn is None else tn
    tm = M if tm >= M else _round_down(tm, _SUB)
    tn = D_out if tn >= D_out else _round_down(tn, _LANE)

    def footprint(tm_, tn_):
        fp = 2 * tm_ * tk * in_bytes       # x tile, double-buffered
        fp += 2 * tk * tn_ * in_bytes      # w tile, double-buffered
        fp += 2 * tm_ * tn_ * out_bytes    # out tile, double-buffered
        fp += 2 * _SUB * tn_ * 4           # bias tile (sublane-padded)
        if multi_k:
            fp += tm_ * tn_ * 4            # f32 accumulator scratch
        return fp

    while footprint(tm, tn) > budget:
        if tm > 256 and tm >= tn:
            tm = _round_down(tm // 2, _SUB)
        elif tn > 256:
            tn = _round_down(tn // 2, _LANE)
        else:
            break

    num_m = pl.cdiv(M, tm)
    num_j = pl.cdiv(D_out, tn)

    # --- Only the contraction dim needs zero padding for correctness; ragged
    #     M / D_out edge blocks are handled by Pallas read/write masking.
    w = weights
    if multi_k and din_pad != D_in:
        x = jnp.pad(x, ((0, 0), (0, 0), (0, din_pad - D_in)))
        w = jnp.pad(w, ((0, 0), (0, din_pad - D_in), (0, 0)))
    b = biases.reshape(N, 1, D_out)

    if multi_k:
        grid = (num_m, num_j, N, num_k)
        in_specs = [
            pl.BlockSpec((None, tm, tk), lambda m, j, n, k: (n, m, k)),
            pl.BlockSpec((None, tk, tn), lambda m, j, n, k: (n, k, j)),
            pl.BlockSpec((None, 1, tn), lambda m, j, n, k: (n, 0, j)),
        ]
        out_specs = pl.BlockSpec((None, tm, tn), lambda m, j, n, k: (n, m, j))
        scratch = [pltpu.VMEM((tm, tn), jnp.float32)]
        kernel = functools.partial(
            _multi_k_kernel, compute_dtype=compute_dtype, num_k=num_k
        )
        semantics = ("parallel", "parallel", "parallel", "arbitrary")
    else:
        grid = (num_m, num_j, N)
        in_specs = [
            pl.BlockSpec((None, tm, tk), lambda m, j, n: (n, m, 0)),
            pl.BlockSpec((None, tk, tn), lambda m, j, n: (n, 0, j)),
            pl.BlockSpec((None, 1, tn), lambda m, j, n: (n, 0, j)),
        ]
        out_specs = pl.BlockSpec((None, tm, tn), lambda m, j, n: (n, m, j))
        scratch = []
        kernel = functools.partial(_single_k_kernel, compute_dtype=compute_dtype)
        semantics = ("parallel", "parallel", "parallel")

    vmem_limit = int(
        min(0.9 * vmem_cap, max(footprint(tm, tn) + 16 * _MIB, 32 * _MIB))
    )

    cost = pl.CostEstimate(
        flops=2 * N * M * D_in * D_out,
        transcendentals=0,
        bytes_accessed=int(
            num_j * x.size * in_bytes        # x streamed once per D_out tile
            + num_m * w.size * in_bytes      # w streamed once per M tile
            + b.size * jnp.dtype(b.dtype).itemsize
            + N * M * D_out * out_bytes
        ),
    )

    out = pl.pallas_call(
        kernel,
        out_shape=jax.ShapeDtypeStruct((N, M, D_out), out_dtype),
        grid_spec=pltpu.PrefetchScalarGridSpec(
            num_scalar_prefetch=0,
            grid=grid,
            in_specs=in_specs,
            out_specs=out_specs,
            scratch_shapes=scratch,
        ),
        compiler_params=pltpu.CompilerParams(
            dimension_semantics=semantics,
            vmem_limit_bytes=vmem_limit,
        ),
        cost_estimate=cost,
    )(x, w, b)

    return out.reshape(N, B, S, D_out)


def init_params(key, n_abstractions, input_dim, output_dim):
    # Mirrors nn.init.xavier_uniform on a (N, D_in, D_out) tensor:
    # fan_in = D_in * D_out, fan_out = N * D_out.
    fan_in = input_dim * output_dim
    fan_out = n_abstractions * output_dim
    bound = math.sqrt(6.0 / (fan_in + fan_out))
    weights = jax.random.uniform(
        key, (n_abstractions, input_dim, output_dim),
        minval=-bound, maxval=bound, dtype=jnp.float32,
    )
    biases = jnp.zeros((n_abstractions, output_dim), dtype=jnp.float32)
    return weights, biases


if __name__ == "__main__":
    # --- test 1: module-shaped small example (single-K fast path).
    N, B, S, D_in, D_out = 3, 2, 8, 32, 16
    key = jax.random.PRNGKey(0)
    k_w, k_b, k_x = jax.random.split(key, 3)

    weights, biases = init_params(k_w, N, D_in, D_out)
    biases = 0.1 * jax.random.normal(k_b, biases.shape, dtype=jnp.float32)
    state = jax.random.normal(k_x, (N, B, S, D_in), dtype=jnp.float32)

    ref = jnp.einsum("nbsd,nde->nbse", state, weights) + biases[:, None, None, :]

    # exact f32 compute path
    out_f32 = jax.block_until_ready(
        parallel_linear(state, weights, biases, compute_dtype=None)
    )
    assert out_f32.shape == (N, B, S, D_out)
    assert jnp.allclose(out_f32, ref, atol=1e-3, rtol=1e-3)

    # default in-kernel bf16 compute path (f32 accumulation / f32 output)
    out_bf16 = jax.block_until_ready(parallel_linear(state, weights, biases))
    assert out_bf16.shape == (N, B, S, D_out)
    assert jnp.allclose(out_bf16, ref, atol=2e-2, rtol=2e-2)

    # --- test 2: multi-tile m/j, K tiling + K zero-padding (D_in=200, tk=128).
    N2, B2, S2, D_in2, D_out2 = 2, 1, 48, 200, 256
    k_w2, k_x2 = jax.random.split(jax.random.PRNGKey(1))
    w2 = 0.05 * jax.random.normal(k_w2, (N2, D_in2, D_out2), dtype=jnp.float32)
    b2 = jnp.linspace(-1.0, 1.0, N2 * D_out2, dtype=jnp.float32).reshape(N2, D_out2)
    x2 = jax.random.normal(k_x2, (N2, B2, S2, D_in2), dtype=jnp.float32)
    ref2 = jnp.einsum("nbsd,nde->nbse", x2, w2) + b2[:, None, None, :]

    out2 = jax.block_until_ready(
        parallel_linear(x2, w2, b2, tm=16, tn=128, tk=128, compute_dtype=None)
    )
    assert out2.shape == (N2, B2, S2, D_out2)
    assert jnp.allclose(out2, ref2, atol=1e-3, rtol=1e-3)

    out2_bf16 = jax.block_until_ready(
        parallel_linear(x2, w2, b2, tm=16, tn=128, tk=128)
    )
    assert jnp.allclose(out2_bf16, ref2, atol=5e-2, rtol=5e-2)

    # --- test 3: ragged (non-dividing) M and D_out edge blocks, single-K.
    N3, B3, S3, D_in3, D_out3 = 2, 1, 24, 64, 192
    k_w3, k_x3 = jax.random.split(jax.random.PRNGKey(2))
    w3 = 0.1 * jax.random.normal(k_w3, (N3, D_in3, D_out3), dtype=jnp.float32)
    b3 = 0.1 * jax.random.normal(jax.random.PRNGKey(3), (N3, D_out3), dtype=jnp.float32)
    x3 = jax.random.normal(k_x3, (N3, B3, S3, D_in3), dtype=jnp.float32)
    ref3 = jnp.einsum("nbsd,nde->nbse", x3, w3) + b3[:, None, None, :]

    out3 = jax.block_until_ready(
        parallel_linear(x3, w3, b3, tm=16, tn=128, compute_dtype=None)
    )
    assert out3.shape == (N3, B3, S3, D_out3)
    assert jnp.allclose(out3, ref3, atol=1e-3, rtol=1e-3)

    print("KERNEL_OK")
</pallas_src>

<mosaic_0001>
module attributes {stable_mosaic.version = 11 : i64} {
  func.func @_single_k_kernel(%arg0: i32, %arg1: i32, %arg2: i32, %arg3: memref<1x16x32xf32, #tpu.memory_space<vmem>>, %arg4: memref<1x32x16xf32, #tpu.memory_space<vmem>>, %arg5: memref<1x1x16xf32, #tpu.memory_space<vmem>>, %arg6: memref<1x16x16xf32, #tpu.memory_space<vmem>>) attributes {dimension_semantics = [#tpu.dimension_semantics<parallel>, #tpu.dimension_semantics<parallel>, #tpu.dimension_semantics<parallel>], iteration_bounds = array<i64: 1, 1, 3>, scalar_prefetch = 0 : i64, scratch_operands = 0 : i64, tpu.core_type = #tpu.core_type<tc>, window_params = [{transform_indices = @transform_0, window_bounds = array<i64: 1, 16, 32>}, {transform_indices = @transform_1, window_bounds = array<i64: 1, 32, 16>}, {transform_indices = @transform_2, window_bounds = array<i64: 1, 1, 16>}, {transform_indices = @transform_3, window_bounds = array<i64: 1, 16, 16>}]} {
    %c0 = arith.constant 0 : index
    %c0_0 = arith.constant 0 : index
    %c0_1 = arith.constant 0 : index
    %0 = vector.load %arg3[%c0, %c0_0, %c0_1] : memref<1x16x32xf32, #tpu.memory_space<vmem>>, vector<1x16x32xf32>
    %1 = vector.shape_cast %0 : vector<1x16x32xf32> to vector<16x32xf32>
    %c0_2 = arith.constant 0 : index
    %c0_3 = arith.constant 0 : index
    %c0_4 = arith.constant 0 : index
    %2 = vector.load %arg4[%c0_2, %c0_3, %c0_4] : memref<1x32x16xf32, #tpu.memory_space<vmem>>, vector<1x32x16xf32>
    %3 = vector.shape_cast %2 : vector<1x32x16xf32> to vector<32x16xf32>
    %cst = arith.constant dense<0.000000e+00> : vector<16x16xf32>
    %4 = tpu.matmul %1, %3, %cst {dimension_numbers = #tpu.dot_dimension_numbers<[1], [0], [0], [1], [0, 0, 1, 1], [], []>} : vector<16x32xf32>, vector<32x16xf32>, vector<16x16xf32> -> vector<16x16xf32>
    %c0_5 = arith.constant 0 : index
    %c0_6 = arith.constant 0 : index
    %c0_7 = arith.constant 0 : index
    %5 = vector.load %arg5[%c0_5, %c0_6, %c0_7] : memref<1x1x16xf32, #tpu.memory_space<vmem>>, vector<1x1x16xf32>
    %6 = vector.shape_cast %5 : vector<1x1x16xf32> to vector<1x16xf32>
    %7 = vector.broadcast %6 : vector<1x16xf32> to vector<16x16xf32>
    %8 = arith.addf %4, %7 : vector<16x16xf32>
    %c0_8 = arith.constant 0 : index
    %c0_9 = arith.constant 0 : index
    %c0_10 = arith.constant 0 : index
    %9 = vector.load %arg6[%c0_8, %c0_9, %c0_10] : memref<1x16x16xf32, #tpu.memory_space<vmem>>, vector<1x16x16xf32>
    %10 = vector.shape_cast %9 : vector<1x16x16xf32> to vector<16x16xf32>
    %11 = vector.shape_cast %8 : vector<16x16xf32> to vector<1x16x16xf32>
    tpu.vector_store %arg6[%c0_8, %c0_9, %c0_10], %11 {strides = array<i32>} : memref<1x16x16xf32, #tpu.memory_space<vmem>>, vector<1x16x16xf32>,
    return
  }
  func.func @transform_0(%arg0: i32, %arg1: i32, %arg2: i32) -> (i32, i32, i32) {
    %c0_i32 = arith.constant 0 : i32
    %c0_i32_0 = arith.constant 0 : i32
    return %arg2, %arg0, %c0_i32 : i32, i32, i32
  }
  func.func @transform_1(%arg0: i32, %arg1: i32, %arg2: i32) -> (i32, i32, i32) {
    %c0_i32 = arith.constant 0 : i32
    %c0_i32_0 = arith.constant 0 : i32
    return %arg2, %c0_i32, %arg1 : i32, i32, i32
  }
  func.func @transform_2(%arg0: i32, %arg1: i32, %arg2: i32) -> (i32, i32, i32) {
    %c0_i32 = arith.constant 0 : i32
    %c0_i32_0 = arith.constant 0 : i32
    return %arg2, %c0_i32, %arg1 : i32, i32, i32
  }
  func.func @transform_3(%arg0: i32, %arg1: i32, %arg2: i32) -> (i32, i32, i32) {
    %c0_i32 = arith.constant 0 : i32
    return %arg2, %arg0, %arg1 : i32, i32, i32
  }
}

</mosaic_0001>

<bundles_post_ra>
// kernel: tpu_custom_call.1
= control target key start
LH: loop header
LB: loop body
LE: loop exit
PB: predicated region body
PF: predicated region fallthrough
CT: control target
= control target key end

     0   :  { %8 = vsyncpa [#allocation3], 0  ;;  %s811_s0 = inlined_call_operand.vmem [shape: f32[3,16,32], index: 0, kind: input, shape index: {}]   ;;  %s812_s1 = inlined_call_operand.vmem [shape: f32[3,32,16], index: 1, kind: input, shape index: {}]   ;;  %s813_s2 = inlined_call_operand.vmem [shape: f32[3,1,16], index: 2, kind: input, shape index: {}]   ;;  %s814_s3 = inlined_call_operand.hbm [shape: f32[3,16,16], index: 3, kind: output, shape index: {}]  }
   0x1   :  { %10 = vsyncpa [#allocation3 + $0x1], 0  ;;  %s689_s12 = smov 0   ;;  %s691_s13 = smov 0  }
   0x2   :  { %s693_s14 = smov 0   ;;  %s695_s15 = smov 0  }
   0x3   :  { %s697_s16 = smov 0   ;;  %s699_s17 = smov 0  }
   0x4 LB: > { %s493_s18 = sadd.s32 4294967295, %s664_s17   ;;  %s494_s19 = sadd.s32 4294967294, %s664_s17   ;;  %s664_s17 = sphi %s699_s17, %s16_s17   ;;  %s660_s16 = sphi %s697_s16, %s821_s16   ;;  %s656_s15 = sphi %s695_s15, %s820_s15   ;;  %s652_s14 = sphi %s693_s14, %s819_s14   ;;  %s648_s13 = sphi %s691_s13, %s818_s13   ;;  %s644_s12 = sphi %s689_s12, %s817_s12  }
   0x5   : > { %s28_s20 = sadd.s32 1, %s660_s16  ;;  %s130_s21 = sadd.s32 1, %s652_s14 }
   0x6   : > { %p29_p0 = scmp.ge.s32.totalorder %s28_s20, 3  ;;  %p140_p1 = scmp.ne.s32.totalorder %s652_s14, %s648_s13 }
   0x7   : > { %p141_p2 = scmp.eq.s32.totalorder %s493_s18, 2  ;;  %p146_p3 = scmp.ne.s32.totalorder %s648_s13, %s644_s12 }
   0x8   : > { %s823_s20 = smov (%p29_p0, %s28_s20), 0  ;;  %p147_p5 = scmp.eq.s32.totalorder %s494_s19, 2 }
   0x9   : > { %p729_p4 = por %p141_p2, %p140_p1  ;;  %s123_s23 = ssub.s32 %s660_s16, %s823_s20 }
   0xa   : > { %p497_p6 = scmp.ge.s32.totalorder %s664_s17, 1  ;;  %p128_p7 = scmp.eq.s32.totalorder %s123_s23, 0 }
   0xb   : > { %p736_p8 = por %p147_p5, %p146_p3  ;;  %p198_p9 = scmp.lt.s32.totalorder %s664_s17, 4 }
   0xc   : > { %s742_s25 = scalar_select %p128_p7, %s652_s14, %s130_s21  }
   0xd   : > { %p199_p10 = pnand %p497_p6, %p198_p9 }
   0xe   : > { %p241_p11 = scmp.lt.s32.totalorder (!%p199_p10), %s656_s15, 2  ;;  %s237_s8 = sand.u32 (!%p199_p10), 1, %s648_s13  }
   0xf   : > { %202 = sbr.rel (%p199_p10) target bundleno = 244 (0xf4), region = 32  ;;  %s498_s9 = sshll.u32 (!%p199_p10), %s237_s8, 4 }
  0x10   : > { %s239_s19 = scalar_lea.vmem (!%p199_p10), [#allocation2], %s498_s9  ;;  %s513_s23 = sshll.u32 (!%p199_p10), %s656_s15, 8 }
  0x11   : > { %s380_s21 = sshll.u32 (!%p199_p10), %s239_s19, 4  ;;  %s764_s29 = scalar_lea.hbm (!%p199_p10), %s814_s3, %s513_s23  ;;  %s759_s21 = int_to_ptr.vmem [resolvable:$true] %s380_s21 }
  0x12   : > { %s666_s30 = smov (!%p199_p10), [#allocation2]  }
  0x14   : > { %s242_s26 = scalar_select %p241_p11, %s656_s15, 2  ;;  %vm278_vm0 = vcmask 261120   ;;  %vm360_vm1 = vcmask 130048  }
  0x15   : > { %s588_s15 = scalar_lea.vmem %s759_s21, 256 }
  0x16   : > { %s512_s27 = sshll.u32 %s242_s26, 5  ;;  %s511_s28 = sshll.u32 %s242_s26, 4 }
  0x17   : > { %s257_s4 = scalar_lea.vmem %s812_s1, %s512_s27  ;;  %s248_s7 = scalar_lea.vmem %s811_s0, %s511_s28 }
  0x18   : > { %v270_v0 = vld [vmem:[%s257_s4 + $0x18] sm:$0xff]  ;;  %v269_v1 = vld [vmem:[%s257_s4 + $0x10] sm:$0xff]  ;;  %v265_v2 = vld [vmem:[%s248_s7] sm:$0xff]  ;;  %s263_s18 = scalar_lea.vmem %s813_s2, %s242_s26  ;;  %s766_s26 = scalar_lea.sflag [#allocation3], %s237_s8 }
  0x19   : > { %520 = vmatprep.subr.mxu0 %v270_v0  ;;  %v268_v3 = vld [vmem:[%s257_s4 + $0x8] sm:$0xff]  ;;  %528 = vmatprep.mubr.msk.f32.mxu0 %vm278_vm0, %v265_v2  ;;  %v267_v4 = vld [vmem:[%s257_s4] sm:$0xff]  ;;  %p589_p12 = scmp.ne.s32.totalorder %s759_s21, %s588_s15  ;;  %s592_s4 = sshll.u32 %s666_s30, 4  ;;  %s593_s4 = int_to_ptr.vmem [resolvable:$false] %s592_s4 }
  0x1a   : > { %521 = vmatpush3.msra.mxu0 %v270_v0  ;;  %v266_v5 = vld [vmem:[%s248_s7 + $0x8] sm:$0xff]  ;;  %v503_v6 = vld [vmem:[%s263_s18] ss:$0 sm:$0xff]  ;;  %s594_s5 = scalar_lea.vmem %s593_s4, 512  ;;  %p595_p1 = scmp.lt.s32.totalorder %s759_s21, %s593_s4 }
  0x1b   : > { %522 = vmatprep.subr.mxu0 %v269_v1  ;;  %p590_p13 = pnand %p589_p12, %p729_p4  ;;  %p596_p2 = scmp.lt.s32.totalorder %s594_s5, %s588_s15 }
  0x1c   : > { %523 = vmatpush3.msra.mxu0 %v269_v1 }
  0x1d   : > { %524 = vmatprep.subr.mxu0 %v268_v3  ;;  %p591_p0 = pneg %p590_p13  ;;  %p597_p3 = por %p596_p2, %p595_p1 }
  0x1e   : > { %525 = vmatpush3.msra.mxu0 %v268_v3 }
  0x1f   : > { %526 = vmatprep.subr.mxu0 %v267_v4  ;;  %p598_p5 = pnand %p597_p3, %p591_p0 }
  0x20   : > { %527 = vmatpush3.msra.mxu0 %v267_v4 }
  0x21   : > { %529 = vmatmul.mubr.msk.f32.vlgmr.msra.gmra.mxu0 %vm278_vm0, %v266_v5 }
  0xe1   : > { %v530_v7 = vpop.f32.mrf.mxu0 }
  0xe2   : > { %v357_v8 = vadd.f32 %v530_v7, %v503_v6 }
  0xe3   : > { %v351_v9 = vpop.f32.mrf.mxu0 }
  0xe4   : > { %362 = vst.msk [vmem:[%s239_s19 + $0x8] sm:$0xff] %vm360_vm1, %v357_v8  ;;  %v352_v10 = vadd.f32 %v503_v6, %v351_v9 }
  0xe6   : > { %361 = vst.msk [vmem:[%s239_s19] sm:$0xff] %vm360_vm1, %v352_v10 }
  0xe7   : > { %601 = shalt.err (!%p598_p5)
}
  0xe8   : > { %s602_s6 = scalar_lea.hbm %s764_s29, 256  ;;  %s606_s9 = scalar_lea.hbm %s814_s3, 768 }
  0xe9   : > { %p603_p6 = scmp.ne.s32.totalorder %s764_s29, %s602_s6  ;;  %p607_p10 = scmp.lt.s32.totalorder %s764_s29, %s814_s3 }
  0xea   : > { %p608_p11 = scmp.lt.s32.totalorder %s606_s9, %s602_s6 }
  0xeb   : > { %p604_p7 = pnand %p603_p6, %p729_p4 }
  0xec   : > { %p609_p12 = por %p608_p11, %p607_p10 }
  0xed   : > { %p605_p9 = pneg %p604_p7 }
  0xef   : > { %p610_p13 = pnand %p609_p12, %p605_p9 }
  0xf1   : > { %613 = shalt.err (!%p610_p13)
}
  0xf2   : > { %s667_s18 = smov 128   ;;  %s668_s19 = smov 8  }
  0xf3   : > { %531 = dma.vmem_to_hbm [thread:$0]  (%p729_p4), %s759_s21, 256, %s764_s29, %s766_s26, %s667_s18, %s667_s18, %s668_s19  }
  0xf4 PF: > { %p537_p0 = scmp.ge.s32.totalorder %s664_s17, 2  ;;  %s395_s23 = sand.u32 1, %s644_s12  }
  0xf5   : > { %s396_s27 = scalar_lea.sflag [#allocation3], %s395_s23 }
  0xf6   : > { %p534_p1 = pnand %p537_p0, %p736_p8 }
  0xf8   : > { %p535_p2 = pneg %p534_p1 }
  0xfa   : > { %639 = dma.done.wait (%p535_p2), %s396_s27, 256  }
  0xfb   : > { %641 = vsyncadd (%p535_p2), %s396_s27, 4294967040  ;;  %s16_s17 = sadd.s32 1, %s664_s17   ;;  %s817_s12 = smov %s648_s13 }
  0xfc   : > { %p13_p3 = scmp.ge.s32.totalorder %s16_s17, 5   ;;  %s818_s13 = smov %s652_s14 }
  0xfd   : > { %s819_s14 = smov %s742_s25  ;;  %s820_s15 = smov %s660_s16 }
  0xfe   : > { %s821_s16 = smov %s823_s20  ;;  %15 = sbr.rel (!%p13_p3) target bundleno = 4 (0x4), region = 73 }
 0x103   :  { %401 = vsyncpa [#allocation3], 1 }
 0x104   :  { %403 = vsyncpa [#allocation3 + $0x1], 1 }

</bundles_post_ra>
